<compile_context>
chip_gen: v6e
topology: v6e:2x2x1
jax: 0.10.0
libtpu: 0.0.40
codegen_flags: <defaults>
</compile_context>

<pallas_src>
import functools

import jax
import jax.numpy as jnp
from jax.experimental import pallas as pl
from jax.experimental.pallas import tpu as pltpu


def _round_up(x, m):
    return (x + m - 1) // m * m


def vae_kernel(
    x_ref, eps_ref,
    w1_ref, b1_ref,
    w2_ref, b2_ref,
    w3_ref, b3_ref,          # fused [w31 || w32], [b31 || b32]
    w4_ref, b4_ref,
    w5_ref, b5_ref,
    w6_ref, b6_ref,
    recon_ref, muvar_ref,
    *, latent_pad, compute_dtype,
):
    x = x_ref[...]

    def dense(a, w_ref, b_ref):
        # bf16 (or f32) MXU inputs, f32 accumulation, f32 bias add.
        return (
            jnp.dot(
                a.astype(compute_dtype),
                w_ref[...].astype(compute_dtype),
                preferred_element_type=jnp.float32,
            )
            + b_ref[...]
        )

    # ---- encode ----
    h1 = jnp.maximum(dense(x, w1_ref, b1_ref), 0.0)
    h2 = jnp.maximum(dense(h1, w2_ref, b2_ref), 0.0)
    muvar = dense(h2, w3_ref, b3_ref)          # (tile_b, 2*latent_pad)
    mu = muvar[:, :latent_pad]                 # 128-aligned slices (no reshuffle)
    logvar = muvar[:, latent_pad:]

    # ---- reparameterize (f32 elementwise: VPU + EUP exp) ----
    std = jnp.exp(0.5 * logvar)
    z = mu + eps_ref[...] * std

    # ---- decode ----
    h3 = jnp.maximum(dense(z, w4_ref, b4_ref), 0.0)
    h4 = jnp.maximum(dense(h3, w5_ref, b5_ref), 0.0)
    recon = dense(h4, w6_ref, b6_ref)

    recon_ref[...] = recon.astype(recon_ref.dtype)
    muvar_ref[...] = muvar.astype(muvar_ref.dtype)


@functools.partial(jax.jit, static_argnames=("tile_b", "compute_dtype"))
def vae_forward(x, params, eps, *, tile_b=128, compute_dtype=jnp.float32):
    """Full VAE forward (encode -> reparameterize -> decode) in one Pallas call.

    x:      (B, input_dim) float32
    params: dict of weights (in, out) and biases (1, out), float32
    eps:    (B, latent_dim) float32 reparameterization noise
    returns (recon_x, mu, logvar) with original (un-padded) shapes.
    """
    B, input_dim = x.shape
    first = params["w1"].shape[1]
    second = params["w2"].shape[1]
    latent = params["w31"].shape[1]

    LANE = 128
    in_p = _round_up(input_dim, LANE)
    f_p = _round_up(first, LANE)
    s_p = _round_up(second, LANE)
    l_p = _round_up(latent, LANE)

    # Batch tiling (sublane-aligned); pad B up to a multiple of the tile.
    tile_b = min(tile_b, _round_up(B, 8))
    B_p = _round_up(B, tile_b)
    grid = (B_p // tile_b,)

    def pad2(a, rows, cols):
        return jnp.pad(a, ((0, rows - a.shape[0]), (0, cols - a.shape[1])))

    # Activations (zero-padded rows/cols are inert through the ReLU chains).
    x_p = pad2(x, B_p, in_p).astype(jnp.float32)
    eps_p = pad2(eps, B_p, l_p).astype(jnp.float32)

    # Fused + lane-padded weights; weights cast to the matmul compute dtype.
    w1 = pad2(params["w1"], in_p, f_p).astype(compute_dtype)
    w2 = pad2(params["w2"], f_p, s_p).astype(compute_dtype)
    w3 = jnp.concatenate(
        [pad2(params["w31"], s_p, l_p), pad2(params["w32"], s_p, l_p)], axis=1
    ).astype(compute_dtype)
    w4 = pad2(params["w4"], l_p, s_p).astype(compute_dtype)
    w5 = pad2(params["w5"], s_p, f_p).astype(compute_dtype)
    w6 = pad2(params["w6"], f_p, in_p).astype(compute_dtype)

    b1 = pad2(params["b1"], 1, f_p).astype(jnp.float32)
    b2 = pad2(params["b2"], 1, s_p).astype(jnp.float32)
    b3 = jnp.concatenate(
        [pad2(params["b31"], 1, l_p), pad2(params["b32"], 1, l_p)], axis=1
    ).astype(jnp.float32)
    b4 = pad2(params["b4"], 1, s_p).astype(jnp.float32)
    b5 = pad2(params["b5"], 1, f_p).astype(jnp.float32)
    b6 = pad2(params["b6"], 1, in_p).astype(jnp.float32)

    def act_spec(width):
        return pl.BlockSpec((tile_b, width), lambda i: (i, 0))

    def const_spec(shape):
        # Weight/bias resident across all grid steps (constant block index →
        # DMA'd once, no re-fetch per batch tile).
        return pl.BlockSpec(shape, lambda i: (0, 0))

    in_specs = [
        act_spec(in_p),                 # x
        act_spec(l_p),                  # eps
        const_spec((in_p, f_p)), const_spec((1, f_p)),
        const_spec((f_p, s_p)), const_spec((1, s_p)),
        const_spec((s_p, 2 * l_p)), const_spec((1, 2 * l_p)),
        const_spec((l_p, s_p)), const_spec((1, s_p)),
        const_spec((s_p, f_p)), const_spec((1, f_p)),
        const_spec((f_p, in_p)), const_spec((1, in_p)),
    ]
    out_specs = (act_spec(in_p), act_spec(2 * l_p))
    out_shapes = (
        jax.ShapeDtypeStruct((B_p, in_p), jnp.float32),       # recon (padded)
        jax.ShapeDtypeStruct((B_p, 2 * l_p), jnp.float32),    # mu || logvar
    )

    inputs = (x_p, eps_p, w1, b1, w2, b2, w3, b3, w4, b4, w5, b5, w6, b6)

    flops = 2 * B_p * (
        in_p * f_p + f_p * s_p + s_p * 2 * l_p + l_p * s_p + s_p * f_p + f_p * in_p
    )
    bytes_accessed = sum(int(a.size) * a.dtype.itemsize for a in inputs)
    bytes_accessed += (B_p * in_p + B_p * 2 * l_p) * 4
    cost = pl.CostEstimate(
        flops=flops, transcendentals=B_p * l_p, bytes_accessed=bytes_accessed
    )

    recon_p, muvar_p = pl.pallas_call(
        functools.partial(vae_kernel, latent_pad=l_p, compute_dtype=compute_dtype),
        out_shape=out_shapes,
        grid=grid,
        in_specs=in_specs,
        out_specs=out_specs,
        compiler_params=pltpu.CompilerParams(
            dimension_semantics=("parallel",),
        ),
        cost_estimate=cost,
    )(*inputs)

    recon = recon_p[:B, :input_dim]
    mu = muvar_p[:B, :latent]
    logvar = muvar_p[:B, l_p:l_p + latent]
    return recon, mu, logvar


def init_params(key, input_dim, first_layer_dim, second_layer_dim, latent_dim):
    """Deterministic init mimicking nn.Linear's U(-1/sqrt(fan_in), 1/sqrt(fan_in))."""
    dims = {
        "1": (input_dim, first_layer_dim),
        "2": (first_layer_dim, second_layer_dim),
        "31": (second_layer_dim, latent_dim),
        "32": (second_layer_dim, latent_dim),
        "4": (latent_dim, second_layer_dim),
        "5": (second_layer_dim, first_layer_dim),
        "6": (first_layer_dim, input_dim),
    }
    params = {}
    for name, (fan_in, fan_out) in dims.items():
        key, kw, kb = jax.random.split(key, 3)
        bound = 1.0 / jnp.sqrt(jnp.float32(fan_in))
        params[f"w{name}"] = jax.random.uniform(
            kw, (fan_in, fan_out), jnp.float32, -bound, bound
        )
        params[f"b{name}"] = jax.random.uniform(
            kb, (1, fan_out), jnp.float32, -bound, bound
        )
    return params


def ref_forward(x, p, eps):
    h1 = jnp.maximum(x @ p["w1"] + p["b1"], 0.0)
    h2 = jnp.maximum(h1 @ p["w2"] + p["b2"], 0.0)
    mu_r = h2 @ p["w31"] + p["b31"]
    logvar_r = h2 @ p["w32"] + p["b32"]
    z = mu_r + eps * jnp.exp(0.5 * logvar_r)
    h3 = jnp.maximum(z @ p["w4"] + p["b4"], 0.0)
    h4 = jnp.maximum(h3 @ p["w5"] + p["b5"], 0.0)
    return h4 @ p["w6"] + p["b6"], mu_r, logvar_r


if __name__ == "__main__":
    # Small shapes consistent with the module's fully-connected VAE.
    batch = 8
    input_dim = 256
    first_layer_dim = 128
    second_layer_dim = 64
    latent_dim = 32

    key = jax.random.PRNGKey(0)
    key, kx, keps, kparams = jax.random.split(key, 4)

    x = jax.random.normal(kx, (batch, input_dim), jnp.float32)
    eps = jax.random.normal(keps, (batch, latent_dim), jnp.float32)
    params = init_params(kparams, input_dim, first_layer_dim, second_layer_dim, latent_dim)

    # --- f32 matmul path: bitwise-close to the pure-JAX reference ---
    recon_x, mu, logvar = vae_forward(x, params, eps, compute_dtype=jnp.float32)
    jax.block_until_ready((recon_x, mu, logvar))

    r_ref, mu_ref_v, lv_ref_v = ref_forward(x, params, eps)
    assert recon_x.shape == (batch, input_dim)
    assert mu.shape == (batch, latent_dim) and logvar.shape == (batch, latent_dim)
    assert jnp.allclose(recon_x, r_ref, atol=1e-4, rtol=1e-4)
    assert jnp.allclose(mu, mu_ref_v, atol=1e-5, rtol=1e-5)
    assert jnp.allclose(logvar, lv_ref_v, atol=1e-5, rtol=1e-5)

    # --- bf16 matmul-input path (f32 accumulation): looser tolerance ---
    recon_bf, mu_bf, lv_bf = vae_forward(x, params, eps, compute_dtype=jnp.bfloat16)
    jax.block_until_ready((recon_bf, mu_bf, lv_bf))
    assert jnp.allclose(recon_bf, r_ref, atol=1e-1, rtol=1e-1)
    assert jnp.allclose(mu_bf, mu_ref_v, atol=1e-1, rtol=1e-1)
    assert jnp.allclose(lv_bf, lv_ref_v, atol=1e-1, rtol=1e-1)

    print("KERNEL_OK")
</pallas_src>

<mosaic_0001>
module attributes {stable_mosaic.version = 11 : i64} {
  func.func @vae_kernel(%arg0: i32, %arg1: memref<8x256xf32, #tpu.memory_space<vmem>>, %arg2: memref<8x128xf32, #tpu.memory_space<vmem>>, %arg3: memref<256x128xf32, #tpu.memory_space<vmem>>, %arg4: memref<1x128xf32, #tpu.memory_space<vmem>>, %arg5: memref<128x128xf32, #tpu.memory_space<vmem>>, %arg6: memref<1x128xf32, #tpu.memory_space<vmem>>, %arg7: memref<128x256xf32, #tpu.memory_space<vmem>>, %arg8: memref<1x256xf32, #tpu.memory_space<vmem>>, %arg9: memref<128x128xf32, #tpu.memory_space<vmem>>, %arg10: memref<1x128xf32, #tpu.memory_space<vmem>>, %arg11: memref<128x128xf32, #tpu.memory_space<vmem>>, %arg12: memref<1x128xf32, #tpu.memory_space<vmem>>, %arg13: memref<128x256xf32, #tpu.memory_space<vmem>>, %arg14: memref<1x256xf32, #tpu.memory_space<vmem>>, %arg15: memref<8x256xf32, #tpu.memory_space<vmem>>, %arg16: memref<8x256xf32, #tpu.memory_space<vmem>>) attributes {dimension_semantics = [#tpu.dimension_semantics<parallel>], iteration_bounds = array<i64: 1>, scalar_prefetch = 0 : i64, scratch_operands = 0 : i64, tpu.core_type = #tpu.core_type<tc>, window_params = [{transform_indices = @transform_0, window_bounds = array<i64: 8, 256>}, {transform_indices = @transform_1, window_bounds = array<i64: 8, 128>}, {pipeline_mode = #tpu.pipeline_mode<synchronous>, transform_indices = @transform_2, window_bounds = array<i64: 256, 128>}, {pipeline_mode = #tpu.pipeline_mode<synchronous>, transform_indices = @transform_3, window_bounds = array<i64: 1, 128>}, {pipeline_mode = #tpu.pipeline_mode<synchronous>, transform_indices = @transform_4, window_bounds = array<i64: 128, 128>}, {pipeline_mode = #tpu.pipeline_mode<synchronous>, transform_indices = @transform_5, window_bounds = array<i64: 1, 128>}, {pipeline_mode = #tpu.pipeline_mode<synchronous>, transform_indices = @transform_6, window_bounds = array<i64: 128, 256>}, {pipeline_mode = #tpu.pipeline_mode<synchronous>, transform_indices = @transform_7, window_bounds = array<i64: 1, 256>}, {pipeline_mode = #tpu.pipeline_mode<synchronous>, transform_indices = @transform_8, window_bounds = array<i64: 128, 128>}, {pipeline_mode = #tpu.pipeline_mode<synchronous>, transform_indices = @transform_9, window_bounds = array<i64: 1, 128>}, {pipeline_mode = #tpu.pipeline_mode<synchronous>, transform_indices = @transform_10, window_bounds = array<i64: 128, 128>}, {pipeline_mode = #tpu.pipeline_mode<synchronous>, transform_indices = @transform_11, window_bounds = array<i64: 1, 128>}, {pipeline_mode = #tpu.pipeline_mode<synchronous>, transform_indices = @transform_12, window_bounds = array<i64: 128, 256>}, {pipeline_mode = #tpu.pipeline_mode<synchronous>, transform_indices = @transform_13, window_bounds = array<i64: 1, 256>}, {transform_indices = @transform_14, window_bounds = array<i64: 8, 256>}, {transform_indices = @transform_15, window_bounds = array<i64: 8, 256>}]} {
    %c0 = arith.constant 0 : index
    %c0_0 = arith.constant 0 : index
    %0 = vector.load %arg1[%c0, %c0_0] : memref<8x256xf32, #tpu.memory_space<vmem>>, vector<8x256xf32>
    %c0_1 = arith.constant 0 : index
    %c0_2 = arith.constant 0 : index
    %1 = vector.load %arg3[%c0_1, %c0_2] : memref<256x128xf32, #tpu.memory_space<vmem>>, vector<256x128xf32>
    %cst = arith.constant dense<0.000000e+00> : vector<8x128xf32>
    %2 = tpu.matmul %0, %1, %cst {dimension_numbers = #tpu.dot_dimension_numbers<[1], [0], [0], [1], [0, 0, 1, 1], [], []>} : vector<8x256xf32>, vector<256x128xf32>, vector<8x128xf32> -> vector<8x128xf32>
    %c0_3 = arith.constant 0 : index
    %c0_4 = arith.constant 0 : index
    %3 = vector.load %arg4[%c0_3, %c0_4] : memref<1x128xf32, #tpu.memory_space<vmem>>, vector<1x128xf32>
    %4 = vector.broadcast %3 : vector<1x128xf32> to vector<8x128xf32>
    %5 = arith.addf %2, %4 : vector<8x128xf32>
    %cst_5 = arith.constant 0.000000e+00 : f32
    %6 = vector.broadcast %cst_5 : f32 to vector<8x128xf32>
    %7 = arith.maximumf %5, %6 : vector<8x128xf32>
    %c0_6 = arith.constant 0 : index
    %c0_7 = arith.constant 0 : index
    %8 = vector.load %arg5[%c0_6, %c0_7] : memref<128x128xf32, #tpu.memory_space<vmem>>, vector<128x128xf32>
    %cst_8 = arith.constant dense<0.000000e+00> : vector<8x128xf32>
    %9 = tpu.matmul %7, %8, %cst_8 {dimension_numbers = #tpu.dot_dimension_numbers<[1], [0], [0], [1], [0, 0, 1, 1], [], []>} : vector<8x128xf32>, vector<128x128xf32>, vector<8x128xf32> -> vector<8x128xf32>
    %c0_9 = arith.constant 0 : index
    %c0_10 = arith.constant 0 : index
    %10 = vector.load %arg6[%c0_9, %c0_10] : memref<1x128xf32, #tpu.memory_space<vmem>>, vector<1x128xf32>
    %11 = vector.broadcast %10 : vector<1x128xf32> to vector<8x128xf32>
    %12 = arith.addf %9, %11 : vector<8x128xf32>
    %cst_11 = arith.constant 0.000000e+00 : f32
    %13 = vector.broadcast %cst_11 : f32 to vector<8x128xf32>
    %14 = arith.maximumf %12, %13 : vector<8x128xf32>
    %c0_12 = arith.constant 0 : index
    %c0_13 = arith.constant 0 : index
    %15 = vector.load %arg7[%c0_12, %c0_13] : memref<128x256xf32, #tpu.memory_space<vmem>>, vector<128x256xf32>
    %cst_14 = arith.constant dense<0.000000e+00> : vector<8x256xf32>
    %16 = tpu.matmul %14, %15, %cst_14 {dimension_numbers = #tpu.dot_dimension_numbers<[1], [0], [0], [1], [0, 0, 1, 1], [], []>} : vector<8x128xf32>, vector<128x256xf32>, vector<8x256xf32> -> vector<8x256xf32>
    %c0_15 = arith.constant 0 : index
    %c0_16 = arith.constant 0 : index
    %17 = vector.load %arg8[%c0_15, %c0_16] : memref<1x256xf32, #tpu.memory_space<vmem>>, vector<1x256xf32>
    %18 = vector.broadcast %17 : vector<1x256xf32> to vector<8x256xf32>
    %19 = arith.addf %16, %18 : vector<8x256xf32>
    %20 = vector.extract_strided_slice %19 {offsets = [0, 0], sizes = [8, 128], strides = [1, 1]} : vector<8x256xf32> to vector<8x128xf32>
    %21 = vector.extract_strided_slice %19 {offsets = [0, 128], sizes = [8, 128], strides = [1, 1]} : vector<8x256xf32> to vector<8x128xf32>
    %cst_17 = arith.constant 5.000000e-01 : f32
    %22 = vector.broadcast %cst_17 : f32 to vector<8x128xf32>
    %23 = arith.mulf %22, %21 : vector<8x128xf32>
    %24 = math.exp %23 : vector<8x128xf32>
    %c0_18 = arith.constant 0 : index
    %c0_19 = arith.constant 0 : index
    %25 = vector.load %arg2[%c0_18, %c0_19] : memref<8x128xf32, #tpu.memory_space<vmem>>, vector<8x128xf32>
    %26 = arith.mulf %25, %24 : vector<8x128xf32>
    %27 = arith.addf %20, %26 : vector<8x128xf32>
    %c0_20 = arith.constant 0 : index
    %c0_21 = arith.constant 0 : index
    %28 = vector.load %arg9[%c0_20, %c0_21] : memref<128x128xf32, #tpu.memory_space<vmem>>, vector<128x128xf32>
    %cst_22 = arith.constant dense<0.000000e+00> : vector<8x128xf32>
    %29 = tpu.matmul %27, %28, %cst_22 {dimension_numbers = #tpu.dot_dimension_numbers<[1], [0], [0], [1], [0, 0, 1, 1], [], []>} : vector<8x128xf32>, vector<128x128xf32>, vector<8x128xf32> -> vector<8x128xf32>
    %c0_23 = arith.constant 0 : index
    %c0_24 = arith.constant 0 : index
    %30 = vector.load %arg10[%c0_23, %c0_24] : memref<1x128xf32, #tpu.memory_space<vmem>>, vector<1x128xf32>
    %31 = vector.broadcast %30 : vector<1x128xf32> to vector<8x128xf32>
    %32 = arith.addf %29, %31 : vector<8x128xf32>
    %cst_25 = arith.constant 0.000000e+00 : f32
    %33 = vector.broadcast %cst_25 : f32 to vector<8x128xf32>
    %34 = arith.maximumf %32, %33 : vector<8x128xf32>
    %c0_26 = arith.constant 0 : index
    %c0_27 = arith.constant 0 : index
    %35 = vector.load %arg11[%c0_26, %c0_27] : memref<128x128xf32, #tpu.memory_space<vmem>>, vector<128x128xf32>
    %cst_28 = arith.constant dense<0.000000e+00> : vector<8x128xf32>
    %36 = tpu.matmul %34, %35, %cst_28 {dimension_numbers = #tpu.dot_dimension_numbers<[1], [0], [0], [1], [0, 0, 1, 1], [], []>} : vector<8x128xf32>, vector<128x128xf32>, vector<8x128xf32> -> vector<8x128xf32>
    %c0_29 = arith.constant 0 : index
    %c0_30 = arith.constant 0 : index
    %37 = vector.load %arg12[%c0_29, %c0_30] : memref<1x128xf32, #tpu.memory_space<vmem>>, vector<1x128xf32>
    %38 = vector.broadcast %37 : vector<1x128xf32> to vector<8x128xf32>
    %39 = arith.addf %36, %38 : vector<8x128xf32>
    %cst_31 = arith.constant 0.000000e+00 : f32
    %40 = vector.broadcast %cst_31 : f32 to vector<8x128xf32>
    %41 = arith.maximumf %39, %40 : vector<8x128xf32>
    %c0_32 = arith.constant 0 : index
    %c0_33 = arith.constant 0 : index
    %42 = vector.load %arg13[%c0_32, %c0_33] : memref<128x256xf32, #tpu.memory_space<vmem>>, vector<128x256xf32>
    %cst_34 = arith.constant dense<0.000000e+00> : vector<8x256xf32>
    %43 = tpu.matmul %41, %42, %cst_34 {dimension_numbers = #tpu.dot_dimension_numbers<[1], [0], [0], [1], [0, 0, 1, 1], [], []>} : vector<8x128xf32>, vector<128x256xf32>, vector<8x256xf32> -> vector<8x256xf32>
    %c0_35 = arith.constant 0 : index
    %c0_36 = arith.constant 0 : index
    %44 = vector.load %arg14[%c0_35, %c0_36] : memref<1x256xf32, #tpu.memory_space<vmem>>, vector<1x256xf32>
    %45 = vector.broadcast %44 : vector<1x256xf32> to vector<8x256xf32>
    %46 = arith.addf %43, %45 : vector<8x256xf32>
    %c0_37 = arith.constant 0 : index
    %c0_38 = arith.constant 0 : index
    %47 = vector.load %arg15[%c0_37, %c0_38] : memref<8x256xf32, #tpu.memory_space<vmem>>, vector<8x256xf32>
    tpu.vector_store %arg15[%c0_37, %c0_38], %46 {strides = array<i32>} : memref<8x256xf32, #tpu.memory_space<vmem>>, vector<8x256xf32>,
    %c0_39 = arith.constant 0 : index
    %c0_40 = arith.constant 0 : index
    %48 = vector.load %arg16[%c0_39, %c0_40] : memref<8x256xf32, #tpu.memory_space<vmem>>, vector<8x256xf32>
    tpu.vector_store %arg16[%c0_39, %c0_40], %19 {strides = array<i32>} : memref<8x256xf32, #tpu.memory_space<vmem>>, vector<8x256xf32>,
    return
  }
  func.func @transform_0(%arg0: i32) -> (i32, i32) {
    %c0_i32 = arith.constant 0 : i32
    %c0_i32_0 = arith.constant 0 : i32
    return %arg0, %c0_i32 : i32, i32
  }
  func.func @transform_1(%arg0: i32) -> (i32, i32) {
    %c0_i32 = arith.constant 0 : i32
    %c0_i32_0 = arith.constant 0 : i32
    return %arg0, %c0_i32 : i32, i32
  }
  func.func @transform_2(%arg0: i32) -> (i32, i32) {
    %c0_i32 = arith.constant 0 : i32
    %c0_i32_0 = arith.constant 0 : i32
    %c0_i32_1 = arith.constant 0 : i32
    return %c0_i32, %c0_i32_0 : i32, i32
  }
  func.func @transform_3(%arg0: i32) -> (i32, i32) {
    %c0_i32 = arith.constant 0 : i32
    %c0_i32_0 = arith.constant 0 : i32
    %c0_i32_1 = arith.constant 0 : i32
    return %c0_i32, %c0_i32_0 : i32, i32
  }
  func.func @transform_4(%arg0: i32) -> (i32, i32) {
    %c0_i32 = arith.constant 0 : i32
    %c0_i32_0 = arith.constant 0 : i32
    %c0_i32_1 = arith.constant 0 : i32
    return %c0_i32, %c0_i32_0 : i32, i32
  }
  func.func @transform_5(%arg0: i32) -> (i32, i32) {
    %c0_i32 = arith.constant 0 : i32
    %c0_i32_0 = arith.constant 0 : i32
    %c0_i32_1 = arith.constant 0 : i32
    return %c0_i32, %c0_i32_0 : i32, i32
  }
  func.func @transform_6(%arg0: i32) -> (i32, i32) {
    %c0_i32 = arith.constant 0 : i32
    %c0_i32_0 = arith.constant 0 : i32
    %c0_i32_1 = arith.constant 0 : i32
    return %c0_i32, %c0_i32_0 : i32, i32
  }
  func.func @transform_7(%arg0: i32) -> (i32, i32) {
    %c0_i32 = arith.constant 0 : i32
    %c0_i32_0 = arith.constant 0 : i32
    %c0_i32_1 = arith.constant 0 : i32
    return %c0_i32, %c0_i32_0 : i32, i32
  }
  func.func @transform_8(%arg0: i32) -> (i32, i32) {
    %c0_i32 = arith.constant 0 : i32
    %c0_i32_0 = arith.constant 0 : i32
    %c0_i32_1 = arith.constant 0 : i32
    return %c0_i32, %c0_i32_0 : i32, i32
  }
  func.func @transform_9(%arg0: i32) -> (i32, i32) {
    %c0_i32 = arith.constant 0 : i32
    %c0_i32_0 = arith.constant 0 : i32
    %c0_i32_1 = arith.constant 0 : i32
    return %c0_i32, %c0_i32_0 : i32, i32
  }
  func.func @transform_10(%arg0: i32) -> (i32, i32) {
    %c0_i32 = arith.constant 0 : i32
    %c0_i32_0 = arith.constant 0 : i32
    %c0_i32_1 = arith.constant 0 : i32
    return %c0_i32, %c0_i32_0 : i32, i32
  }
  func.func @transform_11(%arg0: i32) -> (i32, i32) {
    %c0_i32 = arith.constant 0 : i32
    %c0_i32_0 = arith.constant 0 : i32
    %c0_i32_1 = arith.constant 0 : i32
    return %c0_i32, %c0_i32_0 : i32, i32
  }
  func.func @transform_12(%arg0: i32) -> (i32, i32) {
    %c0_i32 = arith.constant 0 : i32
    %c0_i32_0 = arith.constant 0 : i32
    %c0_i32_1 = arith.constant 0 : i32
    return %c0_i32, %c0_i32_0 : i32, i32
  }
  func.func @transform_13(%arg0: i32) -> (i32, i32) {
    %c0_i32 = arith.constant 0 : i32
    %c0_i32_0 = arith.constant 0 : i32
    %c0_i32_1 = arith.constant 0 : i32
    return %c0_i32, %c0_i32_0 : i32, i32
  }
  func.func @transform_14(%arg0: i32) -> (i32, i32) {
    %c0_i32 = arith.constant 0 : i32
    %c0_i32_0 = arith.constant 0 : i32
    return %arg0, %c0_i32 : i32, i32
  }
  func.func @transform_15(%arg0: i32) -> (i32, i32) {
    %c0_i32 = arith.constant 0 : i32
    %c0_i32_0 = arith.constant 0 : i32
    return %arg0, %c0_i32 : i32, i32
  }
}

</mosaic_0001>

<bundles_post_ra>
// kernel: vae_forward.1
= control target key start
LH: loop header
LB: loop body
LE: loop exit
PB: predicated region body
PF: predicated region fallthrough
CT: control target
= control target key end

     0   :  { %v924_v4 = vmov 0.0   ;;  %s1543_s0 = inlined_call_operand.vmem [shape: f32[8,256], index: 0, kind: input, shape index: {}]   ;;  %s1544_s1 = inlined_call_operand.vmem [shape: f32[8,128], index: 1, kind: input, shape index: {}]   ;;  %s1545_s2 = inlined_call_operand.vmem [shape: f32[256,128], index: 2, kind: input, shape index: {}]   ;;  %s1546_s3 = inlined_call_operand.vmem [shape: f32[1,128], index: 3, kind: input, shape index: {}]   ;;  %s1547_s4 = inlined_call_operand.vmem [shape: f32[128,128], index: 4, kind: input, shape index: {}]   ;;  %s1548_s5 = inlined_call_operand.vmem [shape: f32[1,128], index: 5, kind: input, shape index: {}]   ;;  %s1549_s6 = inlined_call_operand.vmem [shape: f32[128,256], index: 6, kind: input, shape index: {}]   ;;  %s1550_s7 = inlined_call_operand.vmem [shape: f32[1,256], index: 7, kind: input, shape index: {}]   ;;  %s1551_s8 = inlined_call_operand.vmem [shape: f32[128,128], index: 8, kind: input, shape index: {}]   ;;  %s1552_s9 = inlined_call_operand.vmem [shape: f32[1,128], index: 9, kind: input, shape index: {}]   ;;  %s1553_s10 = inlined_call_operand.vmem [shape: f32[128,128], index: 10, kind: input, shape index: {}]   ;;  %s1554_s11 = inlined_call_operand.vmem [shape: f32[1,128], index: 11, kind: input, shape index: {}]   ;;  %s1555_s12 = inlined_call_operand.vmem [shape: f32[128,256], index: 12, kind: input, shape index: {}]   ;;  %s1556_s13 = inlined_call_operand.vmem [shape: f32[1,256], index: 13, kind: input, shape index: {}]   ;;  %s1557_s14 = inlined_call_operand.hbm [shape: f32[8,256], index: 14, kind: output, shape index: {0}]   ;;  %s1558_s15 = inlined_call_operand.vmem [shape: f32[8,256], index: 15, kind: output, shape index: {1}]  }
   0x1   :  { %v83_v0 = vld [vmem:[%s1545_s2 + $0xf8] sm:$0xff]  ;;  %v82_v2 = vld [vmem:[%s1545_s2 + $0xf0] sm:$0xff]  ;;  %792 = vmatprep.subr.mxu1 %v924_v4  ;;  %v81_v5 = vld [vmem:[%s1545_s2 + $0xe8] sm:$0xff] }
   0x2   :  { %v67_v1 = vld [vmem:[%s1545_s2 + $0x78] sm:$0xff]  ;;  %706 = vmatprep.subr.mxu0 %v83_v0  ;;  %v66_v3 = vld [vmem:[%s1545_s2 + $0x70] sm:$0xff]  ;;  %v65_v6 = vld [vmem:[%s1545_s2 + $0x68] sm:$0xff] }
   0x3   :  { %707 = vmatpush3.msra.mxu0 %v67_v1  ;;  %v80_v7 = vld [vmem:[%s1545_s2 + $0xe0] sm:$0xff]  ;;  %v79_v9 = vld [vmem:[%s1545_s2 + $0xd8] sm:$0xff]  ;;  %v78_v11 = vld [vmem:[%s1545_s2 + $0xd0] sm:$0xff] }
   0x4   :  { %708 = vmatprep.subr.mxu0 %v82_v2  ;;  %v64_v8 = vld [vmem:[%s1545_s2 + $0x60] sm:$0xff]  ;;  %v63_v10 = vld [vmem:[%s1545_s2 + $0x58] sm:$0xff]  ;;  %v62_v12 = vld [vmem:[%s1545_s2 + $0x50] sm:$0xff] }
   0x5   :  { %709 = vmatpush3.msra.mxu0 %v66_v3  ;;  %v77_v13 = vld [vmem:[%s1545_s2 + $0xc8] sm:$0xff]  ;;  %v177_v16 = vld [vmem:[%s1547_s4 + $0x78] sm:$0xff]  ;;  %v176_v17 = vld [vmem:[%s1547_s4 + $0x70] sm:$0xff] }
   0x6   :  { %710 = vmatprep.subr.mxu0 %v81_v5  ;;  %v51_v14 = vld [vmem:[%s1543_s0 + $0x8] sm:$0xff]  ;;  %v76_v18 = vld [vmem:[%s1545_s2 + $0xc0] sm:$0xff]  ;;  %793 = vmatpush3.msra.mxu1 %v177_v16  ;;  %v75_v21 = vld [vmem:[%s1545_s2 + $0xb8] sm:$0xff] }
   0x7   :  { %711 = vmatpush3.msra.mxu0 %v65_v6  ;;  %v61_v15 = vld [vmem:[%s1545_s2 + $0x48] sm:$0xff]  ;;  %155 = vmatprep.mubr.f32.mxu0 %v51_v14  ;;  %v60_v19 = vld [vmem:[%s1545_s2 + $0x40] sm:$0xff]  ;;  %v59_v22 = vld [vmem:[%s1545_s2 + $0x38] sm:$0xff] }
   0x8   :  { %712 = vmatprep.subr.mxu0 %v80_v7  ;;  %794 = vmatprep.subr.mxu1 %v924_v4  ;;  %v175_v20 = vld [vmem:[%s1547_s4 + $0x68] sm:$0xff]  ;;  %v174_v23 = vld [vmem:[%s1547_s4 + $0x60] sm:$0xff] }
   0x9   :  { %713 = vmatpush3.msra.mxu0 %v64_v8  ;;  %795 = vmatpush3.msra.mxu1 %v176_v17 }
   0xa   :  { %714 = vmatprep.subr.mxu0 %v79_v9  ;;  %796 = vmatprep.subr.mxu1 %v924_v4 }
   0xb   :  { %715 = vmatpush3.msra.mxu0 %v63_v10 }
   0xc   :  { %716 = vmatprep.subr.mxu0 %v78_v11 }
   0xd   :  { %717 = vmatpush3.msra.mxu0 %v62_v12 }
   0xe   :  { %718 = vmatprep.subr.mxu0 %v77_v13 }
   0xf   :  { %719 = vmatpush3.msra.mxu0 %v61_v15 }
  0x10   :  { %720 = vmatprep.subr.mxu0 %v76_v18 }
  0x11   :  { %21 = vsyncpa [#allocation3], 0  ;;  %721 = vmatpush3.msra.mxu0 %v60_v19  ;;  %v74_v24 = vld [vmem:[%s1545_s2 + $0xb0] sm:$0xff]  ;;  %797 = vmatpush3.msra.mxu1 %v175_v20  ;;  %v173_v26 = vld [vmem:[%s1547_s4 + $0x58] sm:$0xff]  ;;  %vm925_vm0 = vmmov 0  }
  0x12   :  { %722 = vmatprep.subr.mxu0 %v75_v21  ;;  %v58_v25 = vld [vmem:[%s1545_s2 + $0x30] sm:$0xff]  ;;  %798 = vmatprep.subr.mxu1 %v924_v4  ;;  %v73_v27 = vld [vmem:[%s1545_s2 + $0xa8] sm:$0xff]  ;;  %v72_v30 = vld [vmem:[%s1545_s2 + $0xa0] sm:$0xff] }
  0x13   :  { %723 = vmatpush3.msra.mxu0 %v59_v22  ;;  %799 = vmatpush3.msra.mxu1 %v174_v23  ;;  %v57_v28 = vld [vmem:[%s1545_s2 + $0x28] sm:$0xff]  ;;  %v172_v29 = vld [vmem:[%s1547_s4 + $0x50] sm:$0xff]  ;;  %v56_v31 = vld [vmem:[%s1545_s2 + $0x20] sm:$0xff] }
  0x14   :  { %724 = vmatprep.subr.mxu0 %v74_v24  ;;  %800 = vmatprep.subr.mxu1 %v924_v4  ;;  %v171_v32 = vld [vmem:[%s1547_s4 + $0x48] sm:$0xff]  ;;  %v71_v33 = vld [vmem:[%s1545_s2 + $0x98] sm:$0xff]  ;;  %v170_v35 = vld [vmem:[%s1547_s4 + $0x40] sm:$0xff] }
  0x15   :  { %725 = vmatpush3.msra.mxu0 %v58_v25  ;;  %801 = vmatpush3.msra.mxu1 %v173_v26  ;;  %v55_v34 = vld [vmem:[%s1545_s2 + $0x18] sm:$0xff]  ;;  %v70_v36 = vld [vmem:[%s1545_s2 + $0x90] sm:$0xff]  ;;  %v69_v39 = vld [vmem:[%s1545_s2 + $0x88] sm:$0xff] }
  0x16   :  { %726 = vmatprep.subr.mxu0 %v73_v27  ;;  %802 = vmatprep.subr.mxu1 %v924_v4  ;;  %v54_v37 = vld [vmem:[%s1545_s2 + $0x10] sm:$0xff]  ;;  %v169_v38 = vld [vmem:[%s1547_s4 + $0x38] sm:$0xff]  ;;  %v53_v40 = vld [vmem:[%s1545_s2 + $0x8] sm:$0xff] }
  0x17   :  { %727 = vmatpush3.msra.mxu0 %v57_v28  ;;  %803 = vmatpush3.msra.mxu1 %v172_v29  ;;  %v168_v41 = vld [vmem:[%s1547_s4 + $0x30] sm:$0xff]  ;;  %v68_v42 = vld [vmem:[%s1545_s2 + $0x80] sm:$0xff]  ;;  %v167_v44 = vld [vmem:[%s1547_s4 + $0x28] sm:$0xff] }
  0x18   :  { %728 = vmatprep.subr.mxu0 %v72_v30  ;;  %804 = vmatprep.subr.mxu1 %v924_v4  ;;  %v52_v43 = vld [vmem:[%s1545_s2] sm:$0xff]  ;;  %v165_v47 = vld [vmem:[%s1547_s4 + $0x18] sm:$0xff]  ;;  %v164_v48 = vld [vmem:[%s1547_s4 + $0x10] sm:$0xff] }
  0x19   :  { %729 = vmatpush3.msra.mxu0 %v56_v31  ;;  %805 = vmatpush3.msra.mxu1 %v171_v32  ;;  %v50_v45 = vld [vmem:[%s1543_s0] sm:$0xff]  ;;  %v163_v49 = vld [vmem:[%s1547_s4 + $0x8] sm:$0xff]  ;;  %v287_v51 = vld [vmem:[%s1549_s6 + $0xf8] sm:$0xff] }
  0x1a   :  { %730 = vmatprep.subr.mxu0 %v71_v33  ;;  %806 = vmatprep.subr.mxu1 %v924_v4  ;;  %v166_v46 = vld [vmem:[%s1547_s4 + $0x20] sm:$0xff]  ;;  %v286_v52 = vld [vmem:[%s1549_s6 + $0xf0] sm:$0xff]  ;;  %v285_v53 = vld [vmem:[%s1549_s6 + $0xe8] sm:$0xff] }
  0x1b   :  { %731 = vmatpush3.msra.mxu0 %v55_v34  ;;  %807 = vmatpush3.msra.mxu1 %v170_v35  ;;  %v162_v50 = vld [vmem:[%s1547_s4] sm:$0xff]  ;;  %v283_v55 = vld [vmem:[%s1549_s6 + $0xd8] sm:$0xff]  ;;  %v282_v56 = vld [vmem:[%s1549_s6 + $0xd0] sm:$0xff] }
  0x1c   :  { %732 = vmatprep.subr.mxu0 %v70_v36  ;;  %808 = vmatprep.subr.mxu1 %v924_v4  ;;  %v284_v54 = vld [vmem:[%s1549_s6 + $0xe0] sm:$0xff]  ;;  %v281_v57 = vld [vmem:[%s1549_s6 + $0xc8] sm:$0xff]  ;;  %v279_v59 = vld [vmem:[%s1549_s6 + $0xb8] sm:$0xff] }
  0x1d   :  { %733 = vmatpush3.msra.mxu0 %v54_v37  ;;  %809 = vmatpush3.msra.mxu1 %v169_v38  ;;  %v280_v58 = vld [vmem:[%s1549_s6 + $0xc0] sm:$0xff]  ;;  %v278_v60 = vld [vmem:[%s1549_s6 + $0xb0] sm:$0xff]  ;;  %v277_v61 = vld [vmem:[%s1549_s6 + $0xa8] sm:$0xff] }
  0x1e   :  { %734 = vmatprep.subr.mxu0 %v69_v39  ;;  %810 = vmatprep.subr.mxu1 %v924_v4  ;;  %v276_v62 = vld [vmem:[%s1549_s6 + $0xa0] sm:$0xff]  ;;  %v275_v63 = vld [vmem:[%s1549_s6 + $0x98] sm:$0xff]  ;;  %v274_v0 = vld [vmem:[%s1549_s6 + $0x90] sm:$0xff] }
  0x1f   :  { %735 = vmatpush3.msra.mxu0 %v53_v40  ;;  %811 = vmatpush3.msra.mxu1 %v168_v41  ;;  %v273_v1 = vld [vmem:[%s1549_s6 + $0x88] sm:$0xff]  ;;  %v272_v2 = vld [vmem:[%s1549_s6 + $0x80] sm:$0xff]  ;;  %v271_v3 = vld [vmem:[%s1549_s6 + $0x78] sm:$0xff] }
  0x20   :  { %736 = vmatprep.subr.mxu0 %v68_v42  ;;  %812 = vmatprep.subr.mxu1 %v924_v4  ;;  %v270_v5 = vld [vmem:[%s1549_s6 + $0x70] sm:$0xff]  ;;  %v269_v6 = vld [vmem:[%s1549_s6 + $0x68] sm:$0xff]  ;;  %v268_v7 = vld [vmem:[%s1549_s6 + $0x60] sm:$0xff] }
  0x21   :  { %737 = vmatpush3.msra.mxu0 %v52_v43  ;;  %813 = vmatpush3.msra.mxu1 %v167_v44  ;;  %v267_v8 = vld [vmem:[%s1549_s6 + $0x58] sm:$0xff]  ;;  %v266_v9 = vld [vmem:[%s1549_s6 + $0x50] sm:$0xff]  ;;  %v265_v10 = vld [vmem:[%s1549_s6 + $0x48] sm:$0xff] }
  0x22   :  { %156 = vmatmul.mubr.f32.vlgmr.msra.gmra.mxu0 %v50_v45  ;;  %814 = vmatprep.subr.mxu1 %v924_v4  ;;  %v264_v11 = vld [vmem:[%s1549_s6 + $0x40] sm:$0xff]  ;;  %v263_v12 = vld [vmem:[%s1549_s6 + $0x38] sm:$0xff]  ;;  %v262_v13 = vld [vmem:[%s1549_s6 + $0x30] sm:$0xff] }
  0x23   :  { %364 = vmatprep.mubr.f32.mxu0 %v924_v4  ;;  %815 = vmatpush3.msra.mxu1 %v166_v46  ;;  %v261_v14 = vld [vmem:[%s1549_s6 + $0x28] sm:$0xff]  ;;  %v702_v16 = vld [vmem:[%s1546_s3] ss:$0 sm:$0xff]  ;;  %v259_v22 = vld [vmem:[%s1549_s6 + $0x18] sm:$0xff] }
  0x24   :  { %816 = vmatprep.subr.mxu1 %v924_v4  ;;  %824 = vmatprep.mubr.msk.f32.mxu1 %vm925_vm0, %v924_v4  ;;  %v260_v21 = vld [vmem:[%s1549_s6 + $0x20] sm:$0xff]  ;;  %v258_v23 = vld [vmem:[%s1549_s6 + $0x10] sm:$0xff]  ;;  %v257_v24 = vld [vmem:[%s1549_s6 + $0x8] sm:$0xff] }
  0x25   :  { %817 = vmatpush3.msra.mxu1 %v165_v47  ;;  %300 = vmatprep.subr.mxu0 %v287_v51  ;;  %v256_v25 = vld [vmem:[%s1549_s6] sm:$0xff]  ;;  %v392_v26 = vld [vmem:[%s1551_s8 + $0x78] sm:$0xff]  ;;  %v391_v27 = vld [vmem:[%s1551_s8 + $0x70] sm:$0xff] }
  0x26   :  { %818 = vmatprep.subr.mxu1 %v924_v4  ;;  %301 = vmatpush1.msra.mxu0 %v286_v52  ;;  %v703_v28 = vld [vmem:[%s1548_s5] ss:$0 sm:$0xff]  ;;  %v390_v33 = vld [vmem:[%s1551_s8 + $0x68] sm:$0xff]  ;;  %v388_v35 = vld [vmem:[%s1551_s8 + $0x58] sm:$0xff] }
  0x27   :  { %819 = vmatpush3.msra.mxu1 %v164_v48  ;;  %302 = vmatprep.subr.mxu0 %v285_v53  ;;  %v389_v34 = vld [vmem:[%s1551_s8 + $0x60] sm:$0xff]  ;;  %v387_v36 = vld [vmem:[%s1551_s8 + $0x50] sm:$0xff]  ;;  %v386_v37 = vld [vmem:[%s1551_s8 + $0x48] sm:$0xff] }
  0x28   :  { %820 = vmatprep.subr.mxu1 %v924_v4  ;;  %303 = vmatpush1.msra.mxu0 %v284_v54  ;;  %v385_v38 = vld [vmem:[%s1551_s8 + $0x40] sm:$0xff]  ;;  %v384_v39 = vld [vmem:[%s1551_s8 + $0x38] sm:$0xff]  ;;  %v383_v40 = vld [vmem:[%s1551_s8 + $0x30] sm:$0xff] }
  0x29   :  { %821 = vmatpush3.msra.mxu1 %v163_v49  ;;  %304 = vmatprep.subr.mxu0 %v283_v55  ;;  %v382_v41 = vld [vmem:[%s1551_s8 + $0x28] sm:$0xff]  ;;  %v381_v42 = vld [vmem:[%s1551_s8 + $0x20] sm:$0xff]  ;;  %v380_v43 = vld [vmem:[%s1551_s8 + $0x18] sm:$0xff] }
  0x2a   :  { %822 = vmatprep.subr.mxu1 %v924_v4  ;;  %305 = vmatpush1.msra.mxu0 %v282_v56  ;;  %v379_v44 = vld [vmem:[%s1551_s8 + $0x10] sm:$0xff]  ;;  %v378_v45 = vld [vmem:[%s1551_s8 + $0x8] sm:$0xff]  ;;  %v377_v46 = vld [vmem:[%s1551_s8] sm:$0xff] }
  0x2b   :  { %823 = vmatpush3.msra.mxu1 %v162_v50  ;;  %306 = vmatprep.subr.mxu0 %v281_v57  ;;  %v486_v47 = vld [vmem:[%s1553_s10 + $0x78] sm:$0xff]  ;;  %v485_v48 = vld [vmem:[%s1553_s10 + $0x70] sm:$0xff]  ;;  %v484_v49 = vld [vmem:[%s1553_s10 + $0x68] sm:$0xff] }
  0x2c   :  { %827 = vmatprep.subr.mxu1 %v924_v4  ;;  %307 = vmatpush1.msra.mxu0 %v280_v58  ;;  %v483_v50 = vld [vmem:[%s1553_s10 + $0x60] sm:$0xff]  ;;  %v482_v51 = vld [vmem:[%s1553_s10 + $0x58] sm:$0xff]  ;;  %v481_v52 = vld [vmem:[%s1553_s10 + $0x50] sm:$0xff] }
  0x2d   :  { %308 = vmatprep.subr.mxu0 %v279_v59  ;;  %v480_v53 = vld [vmem:[%s1553_s10 + $0x48] sm:$0xff]  ;;  %v479_v54 = vld [vmem:[%s1553_s10 + $0x40] sm:$0xff]  ;;  %v478_v55 = vld [vmem:[%s1553_s10 + $0x38] sm:$0xff] }
  0x2e   :  { %309 = vmatpush1.msra.mxu0 %v278_v60  ;;  %v477_v56 = vld [vmem:[%s1553_s10 + $0x30] sm:$0xff]  ;;  %v476_v57 = vld [vmem:[%s1553_s10 + $0x28] sm:$0xff]  ;;  %v475_v58 = vld [vmem:[%s1553_s10 + $0x20] sm:$0xff]  ;;  %v290_v60 = vlaneseq }
  0x2f   :  { %310 = vmatprep.subr.mxu0 %v277_v61  ;;  %v474_v59 = vld [vmem:[%s1553_s10 + $0x18] sm:$0xff] }
  0x30   :  { %311 = vmatpush1.msra.mxu0 %v276_v62  ;;  %v1399_v61 = vshrl.u32 %v290_v60, 7 }
  0x31   :  { %312 = vmatprep.subr.mxu0 %v275_v63  ;;  %v288_v63 = vld [vmem:[%s1550_s7] sm:$0x3] }
  0x32   :  { %313 = vmatpush1.msra.mxu0 %v274_v0  ;;  %v292_v62 = vsub.s32 0, %v1399_v61  ;;  %v296_v0 = vsub.s32 1, %v1399_v61 }
  0x33   :  { %314 = vmatprep.subr.mxu0 %v273_v1 }
  0x34   :  { %315 = vmatpush1.msra.mxu0 %v272_v2  ;;  %v293_v1 = vrot.slane %v288_v63, %v292_v62  ;;  %v297_v2 = vrot.slane %v288_v63, %v296_v0 }
  0x35   :  { %316 = vmatprep.subr.mxu0 %v271_v3 }
  0x36   :  { %317 = vmatpush1.msra.mxu0 %v270_v5 }
  0x37   :  { %318 = vmatprep.subr.mxu0 %v269_v6 }
  0x38   :  { %319 = vmatpush1.msra.mxu0 %v268_v7 }
  0x39   :  { %320 = vmatprep.subr.mxu0 %v267_v8 }
  0x3a   :  { %321 = vmatpush1.msra.mxu0 %v266_v9 }
  0x3b   :  { %322 = vmatprep.subr.mxu0 %v265_v10  ;;  %v374_v10 = vld [vmem:[%s1544_s1] sm:$0xff] }
  0x3c   :  { %323 = vmatpush1.msra.mxu0 %v264_v11 }
  0x3d   :  { %324 = vmatprep.subr.mxu0 %v263_v12 }
  0x3e   :  { %325 = vmatpush1.msra.mxu0 %v262_v13 }
  0x3f   :  { %326 = vmatprep.subr.mxu0 %v261_v14  ;;  %v473_v14 = vld [vmem:[%s1553_s10 + $0x10] sm:$0xff] }
  0x40   :  { %327 = vmatpush1.msra.mxu0 %v260_v21  ;;  %v591_v21 = vld [vmem:[%s1555_s12 + $0xd0] sm:$0xff] }
  0x41   :  { %328 = vmatprep.subr.mxu0 %v259_v22  ;;  %v590_v22 = vld [vmem:[%s1555_s12 + $0xc8] sm:$0xff] }
  0x42   :  { %329 = vmatpush1.msra.mxu0 %v258_v23  ;;  %v589_v23 = vld [vmem:[%s1555_s12 + $0xc0] sm:$0xff] }
  0x43   :  { %330 = vmatprep.subr.mxu0 %v257_v24  ;;  %v588_v24 = vld [vmem:[%s1555_s12 + $0xb8] sm:$0xff] }
  0x44   :  { %331 = vmatpush1.msra.mxu0 %v256_v25  ;;  %v587_v25 = vld [vmem:[%s1555_s12 + $0xb0] sm:$0xff] }
  0x45   :  { %862 = vmatprep.subr.mxu0 %v924_v4 }
  0xe2   :  { %v738_v15 = vpop.f32.mrf.mxu0 }
  0xe4   :  { %v739_v17 = vpop.f32.mrf.mxu0 }
  0xe5   :  { %v740_v18 = vadd.f32 %v739_v17, %v738_v15  ;;  %v472_v15 = vld [vmem:[%s1553_s10 + $0x8] sm:$0xff]  ;;  %v596_v17 = vld [vmem:[%s1555_s12 + $0xf8] sm:$0xff] }
  0xe7   :  { %v158_v19 = vadd.f32 %v740_v18, %v702_v16  ;;  %v471_v16 = vld [vmem:[%s1553_s10] sm:$0xff]  ;;  %v595_v18 = vld [vmem:[%s1555_s12 + $0xf0] sm:$0xff] }
  0xe9   :  { %v161_v20 = vmax.f32 %v158_v19, 0.0  ;;  %v594_v19 = vld [vmem:[%s1555_s12 + $0xe8] sm:$0xff] }
  0xeb   :  { %825 = vmatmul.mubr.f32.vlgmr.msra.gmra.mxu1 %v161_v20  ;;  %v592_v20 = vld [vmem:[%s1555_s12 + $0xd8] sm:$0xff] }
  0xec   :  { %859 = vmatprep.mubr.msk.f32.mxu1 %vm925_vm0, %v924_v4  ;;  %828 = vmatpush3.msra.mxu1 %v392_v26  ;;  %v586_v26 = vld [vmem:[%s1555_s12 + $0xa8] sm:$0xff] }
  0xed   :  { %829 = vmatprep.subr.mxu1 %v924_v4 }
  0xee   :  { %830 = vmatpush3.msra.mxu1 %v391_v27  ;;  %v585_v27 = vld [vmem:[%s1555_s12 + $0xa0] sm:$0xff] }
  0xef   :  { %831 = vmatprep.subr.mxu1 %v924_v4 }
  0xf0   :  { %832 = vmatpush3.msra.mxu1 %v390_v33  ;;  %v579_v33 = vld [vmem:[%s1555_s12 + $0x70] sm:$0xff] }
  0xf1   :  { %833 = vmatprep.subr.mxu1 %v924_v4 }
  0xf2   :  { %834 = vmatpush3.msra.mxu1 %v389_v34  ;;  %v578_v34 = vld [vmem:[%s1555_s12 + $0x68] sm:$0xff] }
  0xf3   :  { %835 = vmatprep.subr.mxu1 %v924_v4 }
  0xf4   :  { %836 = vmatpush3.msra.mxu1 %v388_v35  ;;  %v577_v35 = vld [vmem:[%s1555_s12 + $0x60] sm:$0xff] }
  0xf5   :  { %837 = vmatprep.subr.mxu1 %v924_v4 }
  0xf6   :  { %838 = vmatpush3.msra.mxu1 %v387_v36  ;;  %v576_v36 = vld [vmem:[%s1555_s12 + $0x58] sm:$0xff] }
  0xf7   :  { %839 = vmatprep.subr.mxu1 %v924_v4 }
  0xf8   :  { %840 = vmatpush3.msra.mxu1 %v386_v37  ;;  %v575_v37 = vld [vmem:[%s1555_s12 + $0x50] sm:$0xff] }
  0xf9   :  { %841 = vmatprep.subr.mxu1 %v924_v4 }
  0xfa   :  { %842 = vmatpush3.msra.mxu1 %v385_v38  ;;  %v574_v38 = vld [vmem:[%s1555_s12 + $0x48] sm:$0xff] }
  0xfb   :  { %843 = vmatprep.subr.mxu1 %v924_v4 }
  0xfc   :  { %844 = vmatpush3.msra.mxu1 %v384_v39  ;;  %v573_v39 = vld [vmem:[%s1555_s12 + $0x40] sm:$0xff] }
  0xfd   :  { %845 = vmatprep.subr.mxu1 %v924_v4 }
  0xfe   :  { %846 = vmatpush3.msra.mxu1 %v383_v40  ;;  %v572_v40 = vld [vmem:[%s1555_s12 + $0x38] sm:$0xff] }
  0xff   :  { %847 = vmatprep.subr.mxu1 %v924_v4 }
 0x100   :  { %848 = vmatpush3.msra.mxu1 %v382_v41  ;;  %v571_v41 = vld [vmem:[%s1555_s12 + $0x30] sm:$0xff] }
 0x101   :  { %849 = vmatprep.subr.mxu1 %v924_v4 }
 0x102   :  { %850 = vmatpush3.msra.mxu1 %v381_v42  ;;  %v570_v42 = vld [vmem:[%s1555_s12 + $0x28] sm:$0xff] }
 0x103   :  { %851 = vmatprep.subr.mxu1 %v924_v4 }
 0x104   :  { %852 = vmatpush3.msra.mxu1 %v380_v43  ;;  %v704_v43 = vld [vmem:[%s1552_s9] ss:$0 sm:$0xff] }
 0x105   :  { %853 = vmatprep.subr.mxu1 %v924_v4 }
 0x106   :  { %854 = vmatpush3.msra.mxu1 %v379_v44 }
 0x107   :  { %855 = vmatprep.subr.mxu1 %v924_v4 }
 0x108   :  { %856 = vmatpush3.msra.mxu1 %v378_v45 }
 0x109   :  { %857 = vmatprep.subr.mxu1 %v924_v4 }
 0x10a   :  { %858 = vmatpush3.msra.mxu1 %v377_v46 }
 0x10b   :  { %609 = vmatprep.subr.mxu1 %v596_v17 }
 0x1ab   :  { %v251_v29 = vpop.f32.mrf.mxu1 }
 0x1ac   :  { %v252_v30 = vadd.f32 %v703_v28, %v251_v29  ;;  %v584_v28 = vld [vmem:[%s1555_s12 + $0x98] sm:$0xff]  ;;  %v583_v29 = vld [vmem:[%s1555_s12 + $0x90] sm:$0xff] }
 0x1ad   :  { %v826_v31 = vpop.f32.mrf.mxu1 }
 0x1ae   :  { %v255_v32 = vmax.f32 %v252_v30, 0.0  ;;  %v582_v30 = vld [vmem:[%s1555_s12 + $0x88] sm:$0xff]  ;;  %v581_v31 = vld [vmem:[%s1555_s12 + $0x80] sm:$0xff] }
 0x1b0   :  { %365 = vmatmul.mubr.f32.vlgmr.msra.gmra.mxu0 %v255_v32  ;;  %v580_v32 = vld [vmem:[%s1555_s12 + $0x78] sm:$0xff] }
 0x1b1   :  { %894 = vmatprep.mubr.msk.f32.mxu0 %vm925_vm0, %v924_v4  ;;  %863 = vmatpush3.msra.mxu0 %v486_v47 }
 0x1b2   :  { %864 = vmatprep.subr.mxu0 %v924_v4 }
 0x1b3   :  { %865 = vmatpush3.msra.mxu0 %v485_v48  ;;  %v569_v48 = vld [vmem:[%s1555_s12 + $0x20] sm:$0xff] }
 0x1b4   :  { %866 = vmatprep.subr.mxu0 %v924_v4 }
 0x1b5   :  { %867 = vmatpush3.msra.mxu0 %v484_v49  ;;  %v568_v49 = vld [vmem:[%s1555_s12 + $0x18] sm:$0xff] }
 0x1b6   :  { %868 = vmatprep.subr.mxu0 %v924_v4 }
 0x1b7   :  { %869 = vmatpush3.msra.mxu0 %v483_v50  ;;  %v567_v50 = vld [vmem:[%s1555_s12 + $0x10] sm:$0xff] }
 0x1b8   :  { %870 = vmatprep.subr.mxu0 %v924_v4 }
 0x1b9   :  { %871 = vmatpush3.msra.mxu0 %v482_v51  ;;  %v566_v51 = vld [vmem:[%s1555_s12 + $0x8] sm:$0xff] }
 0x1ba   :  { %872 = vmatprep.subr.mxu0 %v924_v4 }
 0x1bb   :  { %873 = vmatpush3.msra.mxu0 %v481_v52  ;;  %v565_v52 = vld [vmem:[%s1555_s12] sm:$0xff] }
 0x1bc   :  { %874 = vmatprep.subr.mxu0 %v924_v4 }
 0x1bd   :  { %875 = vmatpush3.msra.mxu0 %v480_v53  ;;  %v705_v53 = vld [vmem:[%s1554_s11] ss:$0 sm:$0xff] }
 0x1be   :  { %876 = vmatprep.subr.mxu0 %v924_v4 }
 0x1bf   :  { %877 = vmatpush3.msra.mxu0 %v479_v54 }
 0x1c0   :  { %878 = vmatprep.subr.mxu0 %v924_v4 }
 0x1c1   :  { %879 = vmatpush3.msra.mxu0 %v478_v55 }
 0x1c2   :  { %880 = vmatprep.subr.mxu0 %v924_v4 }
 0x1c3   :  { %881 = vmatpush3.msra.mxu0 %v477_v56 }
 0x1c4   :  { %882 = vmatprep.subr.mxu0 %v924_v4 }
 0x1c5   :  { %883 = vmatpush3.msra.mxu0 %v476_v57 }
 0x1c6   :  { %884 = vmatprep.subr.mxu0 %v924_v4 }
 0x1c7   :  { %885 = vmatpush3.msra.mxu0 %v475_v58  ;;  %v597_v58 = vld [vmem:[%s1556_s13] sm:$0x3] }
 0x1c8   :  { %886 = vmatprep.subr.mxu0 %v924_v4  ;;  %v606_v60 = vrot.slane %v597_v58, %v296_v0 }
 0x1c9   :  { %887 = vmatpush3.msra.mxu0 %v474_v59  ;;  %v602_v59 = vrot.slane %v597_v58, %v292_v62 }
 0x1ca   :  { %888 = vmatprep.subr.mxu0 %v924_v4 }
 0x1cb   :  { %889 = vmatpush3.msra.mxu0 %v473_v14 }
 0x1cc   :  { %890 = vmatprep.subr.mxu0 %v924_v4 }
 0x1cd   :  { %891 = vmatpush3.msra.mxu0 %v472_v15 }
 0x1ce   :  { %892 = vmatprep.subr.mxu0 %v924_v4 }
 0x1cf   :  { %893 = vmatpush3.msra.mxu0 %v471_v16 }
 0x270   :  { %v366_v3 = vpop.f32.mrf.mxu0 }
 0x271   :  { %v367_v5 = vadd.f32 %v366_v3, %v293_v1 }
 0x272   :  { %v368_v6 = vpop.f32.mrf.mxu0 }
 0x273   :  { %682 = vst [vmem:[%s1558_s15] sm:$0xff] %v367_v5  ;;  %v369_v7 = vadd.f32 %v368_v6, %v297_v2 }
 0x275   :  { %v371_v8 = vmul.f32 0.5, %v369_v7  ;;  %683 = vst [vmem:[%s1558_s15 + $0x8] sm:$0xff] %v369_v7 }
 0x277   :  { %v372_v9 = vmul.f32 1.442695, %v371_v8 }
 0x279   :  { %900 = vpow2.f32 %v372_v9 }
 0x286   :  { %v901_v11 = vpop.eup %900 }
 0x287   :  { %v375_v12 = vmul.f32 %v901_v11, %v374_v10 }
 0x289   :  { %v376_v13 = vadd.f32 %v375_v12, %v367_v5 }
 0x28b   :  { %860 = vmatmul.mubr.f32.vlgmr.msra.gmra.mxu1 %v376_v13 }
 0x28c   :  { %673 = vmatprep.mubr.f32.mxu1 %v924_v4  ;;  %v593_v4 = vld [vmem:[%s1555_s12 + $0xe0] sm:$0xff]  ;;  %610 = vmatpush1.msra.mxu1 %v595_v18  ;;  %s926_s12 = smov [#allocation2]  }
 0x28d   :  { %611 = vmatprep.subr.mxu1 %v594_v19  ;;  %s690_s0 = sshll.u32 %s926_s12, 4  ;;  %s691_s0 = int_to_ptr.vmem [resolvable:$true] %s690_s0 }
 0x28e   :  { %612 = vmatpush1.msra.mxu1 %v593_v4  ;;  %s902_s11 = scalar_lea.vmem %s691_s0, 256  ;;  %p907_p1 = scmp.lt.s32.totalorder %s691_s0, %s691_s0 }
 0x28f   :  { %613 = vmatprep.subr.mxu1 %v592_v20  ;;  %p903_p0 = scmp.ne.s32.totalorder %s691_s0, %s902_s11  ;;  %p908_p2 = scmp.lt.s32.totalorder %s902_s11, %s902_s11 }
 0x290   :  { %614 = vmatpush1.msra.mxu1 %v591_v21 }
 0x291   :  { %615 = vmatprep.subr.mxu1 %v590_v22  ;;  %p909_p3 = por %p908_p2, %p907_p1 }
 0x292   :  { %616 = vmatpush1.msra.mxu1 %v589_v23 }
 0x293   :  { %617 = vmatprep.subr.mxu1 %v588_v24  ;;  %p910_p4 = pnand %p909_p3, %p903_p0 }
 0x294   :  { %618 = vmatpush1.msra.mxu1 %v587_v25 }
 0x295   :  { %619 = vmatprep.subr.mxu1 %v586_v26 }
 0x296   :  { %620 = vmatpush1.msra.mxu1 %v585_v27 }
 0x297   :  { %621 = vmatprep.subr.mxu1 %v584_v28 }
 0x298   :  { %622 = vmatpush1.msra.mxu1 %v583_v29 }
 0x299   :  { %623 = vmatprep.subr.mxu1 %v582_v30 }
 0x29a   :  { %624 = vmatpush1.msra.mxu1 %v581_v31 }
 0x29b   :  { %625 = vmatprep.subr.mxu1 %v580_v32 }
 0x29c   :  { %626 = vmatpush1.msra.mxu1 %v579_v33 }
 0x29d   :  { %627 = vmatprep.subr.mxu1 %v578_v34 }
 0x29e   :  { %628 = vmatpush1.msra.mxu1 %v577_v35 }
 0x29f   :  { %629 = vmatprep.subr.mxu1 %v576_v36 }
 0x2a0   :  { %630 = vmatpush1.msra.mxu1 %v575_v37 }
 0x2a1   :  { %631 = vmatprep.subr.mxu1 %v574_v38 }
 0x2a2   :  { %632 = vmatpush1.msra.mxu1 %v573_v39 }
 0x2a3   :  { %633 = vmatprep.subr.mxu1 %v572_v40 }
 0x2a4   :  { %634 = vmatpush1.msra.mxu1 %v571_v41 }
 0x2a5   :  { %635 = vmatprep.subr.mxu1 %v570_v42 }
 0x2a6   :  { %636 = vmatpush1.msra.mxu1 %v569_v48 }
 0x2a7   :  { %637 = vmatprep.subr.mxu1 %v568_v49 }
 0x2a8   :  { %638 = vmatpush1.msra.mxu1 %v567_v50 }
 0x2a9   :  { %639 = vmatprep.subr.mxu1 %v566_v51 }
 0x2aa   :  { %640 = vmatpush1.msra.mxu1 %v565_v52 }
 0x34b   :  { %v466_v44 = vpop.f32.mrf.mxu1 }
 0x34c   :  { %v467_v45 = vadd.f32 %v704_v43, %v466_v44 }
 0x34d   :  { %v861_v46 = vpop.f32.mrf.mxu1 }
 0x34e   :  { %v470_v47 = vmax.f32 %v467_v45, 0.0 }
 0x350   :  { %895 = vmatmul.mubr.f32.vlgmr.msra.gmra.mxu0 %v470_v47 }
 0x410   :  { %v560_v54 = vpop.f32.mrf.mxu0 }
 0x411   :  { %v561_v55 = vadd.f32 %v705_v53, %v560_v54 }
 0x412   :  { %v896_v56 = vpop.f32.mrf.mxu0 }
 0x413   :  { %v564_v57 = vmax.f32 %v561_v55, 0.0 }
 0x415   :  { %674 = vmatmul.mubr.f32.vlgmr.msra.gmra.mxu1 %v564_v57 }
 0x4d5   :  { %v675_v63 = vpop.f32.mrf.mxu1 }
 0x4d6   :  { %v676_v1 = vadd.f32 %v675_v63, %v602_v59 }
 0x4d7   :  { %v677_v2 = vpop.f32.mrf.mxu1 }
 0x4d8   :  { %680 = vst [vmem:[#allocation2] sm:$0xff] %v676_v1  ;;  %v678_v3 = vadd.f32 %v677_v2, %v606_v60 }
 0x4da   :  { %681 = vst [vmem:[#allocation2 + $0x8] sm:$0xff] %v678_v3 }
 0x4db   :  { %913 = shalt.err (!%p910_p4)
}
 0x4dc   :  { %693 = dma.vmem_to_hbm [thread:$0]  %s691_s0, 256, %s1557_s14, [#allocation3]  }
 0x4dd   :  { %922 = dma.done.wait [#allocation3], 256  }
 0x4de   :  { %923 = vsyncadd [#allocation3], 4294967040 }
 0x4df   :  { %701 = vsyncpa [#allocation3], 1 }

</bundles_post_ra>
